<compile_context>
chip_gen: v5e
topology: v5e:2x2
jax: 0.10.0
libtpu: 0.0.40
codegen_flags: <defaults>
</compile_context>

<pallas_src>
import functools

import jax
import jax.numpy as jnp
from jax import lax
from jax.experimental import pallas as pl
from jax.experimental.pallas import tpu as pltpu


def _round_up(x, m):
    return (x + m - 1) // m * m


def _gw_kernel(x_ref, w1_ref, b1_ref, w2_ref, b2_ref, w3_ref, b3_ref, o_ref):
    # x tile arrives as f32; cast to bf16 here (VPU) -> no extra HBM pass.
    x = x_ref[...].astype(jnp.bfloat16)

    # fc1 + ReLU : bf16 MXU matmul, f32 accumulation, f32 elementwise.
    h1 = jnp.dot(x, w1_ref[...], preferred_element_type=jnp.float32) + b1_ref[...]
    h1 = jnp.maximum(h1, 0.0)

    # fc2 + ReLU.
    h2 = jnp.dot(h1.astype(jnp.bfloat16), w2_ref[...],
                 preferred_element_type=jnp.float32) + b2_ref[...]
    h2 = jnp.maximum(h2, 0.0)

    # Output head (hidden -> 1), computed transposed:
    #   (1, H) . (tile, H), contracting the last dim of both operands (the
    #   flash-attention q.k^T form -> MXU transposed-rhs path, no full-tile
    #   XLU transpose of h2).  Result is (1, tile): batch on the lane axis,
    #   so the store is lane-dense / unmasked.
    out_row = lax.dot_general(
        w3_ref[...], h2.astype(jnp.bfloat16),
        dimension_numbers=(((1,), (1,)), ((), ())),
        preferred_element_type=jnp.float32)
    o_ref[...] = (out_row + b3_ref[0, 0]).astype(o_ref.dtype)


def _choose_tiling(batch, tile_b):
    """Pick (tile, padded_batch, grid_steps).

    - batch <= tile_b: one full block, padded only up to 128 rows.
    - batch  > tile_b: round step count up to even (balanced v7x megacore
      split), then shrink the tile to ceil(batch/steps) rounded to 128 so
      padding waste stays below 128 rows per step.
    """
    if batch <= tile_b:
        b_pad = _round_up(batch, 128)
        return b_pad, b_pad, 1
    steps = -(-batch // tile_b)
    if steps % 2:
        steps += 1
    tile = min(_round_up(-(-batch // steps), 128), tile_b)
    b_pad = tile * (-(-batch // tile))
    return tile, b_pad, b_pad // tile


@functools.partial(jax.jit, static_argnames=("tile_b",))
def global_workspace_forward(x, w1, b1, w2, b2, w3, b3, *, tile_b=1024):
    """x: (B, input_size) float32. Weights pre-transposed to (in, out).

    Returns (B, 1) float32.
    """
    B, in_size = x.shape
    hidden = w1.shape[1]
    assert tile_b % 128 == 0, "tile_b must be a multiple of 128"

    tile, b_pad, steps = _choose_tiling(B, tile_b)
    grid = (steps,)

    # x goes in as f32 (cast to bf16 happens inside the kernel).  Pad only if
    # the padded batch differs from B (no-op for tile-aligned batches).
    xf = x.astype(jnp.float32)
    if b_pad != B:
        xf = jnp.pad(xf, ((0, b_pad - B), (0, 0)))

    # Weights are tiny -> pre-cast to bf16 in the wrapper (negligible traffic).
    w1b = w1.astype(jnp.bfloat16)
    w2b = w2.astype(jnp.bfloat16)
    w3r = w3.reshape(1, hidden).astype(jnp.bfloat16)   # row form for the head
    b1f = b1.reshape(1, hidden).astype(jnp.float32)
    b2f = b2.reshape(1, hidden).astype(jnp.float32)
    b3f = b3.reshape(1, 1).astype(jnp.float32)

    # Weights/biases: replicate the full array to every grid step (DMA'd once).
    full = lambda shape: pl.BlockSpec(shape, lambda i: (0,) * len(shape))

    flops = 2 * b_pad * (in_size * hidden + hidden * hidden + hidden)
    bytes_accessed = (b_pad * in_size * 4                       # x (f32 in)
                      + (in_size + hidden + 1) * hidden * 2     # weights (bf16)
                      + (2 * hidden + 1) * 4                    # biases (f32)
                      + b_pad * 4)                              # output (f32)

    out_t = pl.pallas_call(
        _gw_kernel,
        out_shape=jax.ShapeDtypeStruct((1, b_pad), jnp.float32),
        grid_spec=pltpu.PrefetchScalarGridSpec(
            num_scalar_prefetch=0,
            grid=grid,
            in_specs=[
                pl.BlockSpec((tile, in_size), lambda i: (i, 0)),  # x tile (f32)
                full((in_size, hidden)),                          # W1
                full((1, hidden)),                                # b1
                full((hidden, hidden)),                           # W2
                full((1, hidden)),                                # b2
                full((1, hidden)),                                # W3 (row)
                full((1, 1)),                                     # b3
            ],
            # Transposed, lane-dense output: batch on the lane axis.
            out_specs=pl.BlockSpec((1, tile), lambda i: (0, i)),
        ),
        compiler_params=pltpu.CompilerParams(
            dimension_semantics=("parallel",),
        ),
        cost_estimate=pl.CostEstimate(
            flops=flops, transcendentals=0, bytes_accessed=bytes_accessed),
    )(xf, w1b, b1f, w2b, b2f, w3r, b3f)

    return out_t[0, :B].reshape(B, 1)


def init_params(key, input_size, hidden_size):
    """Deterministic init mirroring nn.Linear's U(-1/sqrt(fan_in), 1/sqrt(fan_in)).

    Weights are stored transposed to (in_features, out_features).
    """
    k1, k2, k3, k4, k5, k6 = jax.random.split(key, 6)

    def lin(kw, kb, fan_in, fan_out):
        bound = 1.0 / jnp.sqrt(fan_in)
        w = jax.random.uniform(kw, (fan_in, fan_out), jnp.float32, -bound, bound)
        b = jax.random.uniform(kb, (1, fan_out), jnp.float32, -bound, bound)
        return w, b

    w1, b1 = lin(k1, k2, input_size, hidden_size)
    w2, b2 = lin(k3, k4, hidden_size, hidden_size)
    w3, b3 = lin(k5, k6, hidden_size, 1)
    return w1, b1, w2, b2, w3, b3


def reference_forward(x, w1, b1, w2, b2, w3, b3):
    """Pure-JAX reference mirroring the kernel's precision strategy
    (bf16 matmul operands, f32 accumulation / elementwise)."""
    f32 = lambda a: a.astype(jnp.bfloat16).astype(jnp.float32)
    h1 = jax.nn.relu(f32(x) @ f32(w1) + b1)
    h2 = jax.nn.relu(f32(h1) @ f32(w2) + b2)
    return f32(h2) @ f32(w3) + b3


if __name__ == "__main__":
    key = jax.random.PRNGKey(0)
    kx, kx2, kp = jax.random.split(key, 3)

    input_size, hidden_size = 32, 64
    params = init_params(kp, input_size, hidden_size)

    # Case 1: small, odd batch -> single full block, minimal (128-row) padding.
    x = jax.random.normal(kx, (300, input_size), jnp.float32)
    out = jax.block_until_ready(global_workspace_forward(x, *params))
    ref = reference_forward(x, *params)
    assert out.shape == (300, 1), out.shape
    assert jnp.allclose(out, ref, atol=5e-3, rtol=5e-3), (
        float(jnp.max(jnp.abs(out - ref))))

    # Case 2: batch > tile_b -> multi-step pipeline with an even grid
    # (tile=640, 4 steps, zero padding; both v7x TensorCores get equal work).
    x2 = jax.random.normal(kx2, (2560, input_size), jnp.float32)
    out2 = jax.block_until_ready(
        global_workspace_forward(x2, *params, tile_b=1024))
    ref2 = reference_forward(x2, *params)
    assert out2.shape == (2560, 1), out2.shape
    assert jnp.allclose(out2, ref2, atol=5e-3, rtol=5e-3), (
        float(jnp.max(jnp.abs(out2 - ref2))))

    print("KERNEL_OK")
</pallas_src>

<mosaic_0001>
module attributes {stable_mosaic.version = 11 : i64} {
  func.func @_gw_kernel(%arg0: i32, %arg1: memref<384x32xf32, #tpu.memory_space<vmem>>, %arg2: memref<32x64xbf16, #tpu.memory_space<vmem>>, %arg3: memref<1x64xf32, #tpu.memory_space<vmem>>, %arg4: memref<64x64xbf16, #tpu.memory_space<vmem>>, %arg5: memref<1x64xf32, #tpu.memory_space<vmem>>, %arg6: memref<1x64xbf16, #tpu.memory_space<vmem>>, %arg7: memref<1x1xf32, #tpu.memory_space<vmem>>, %arg8: memref<1x384xf32, #tpu.memory_space<vmem>>) attributes {dimension_semantics = [#tpu.dimension_semantics<parallel>], iteration_bounds = array<i64: 1>, scalar_prefetch = 0 : i64, scratch_operands = 0 : i64, tpu.core_type = #tpu.core_type<tc>, window_params = [{transform_indices = @transform_0, window_bounds = array<i64: 384, 32>}, {pipeline_mode = #tpu.pipeline_mode<synchronous>, transform_indices = @transform_1, window_bounds = array<i64: 32, 64>}, {pipeline_mode = #tpu.pipeline_mode<synchronous>, transform_indices = @transform_2, window_bounds = array<i64: 1, 64>}, {pipeline_mode = #tpu.pipeline_mode<synchronous>, transform_indices = @transform_3, window_bounds = array<i64: 64, 64>}, {pipeline_mode = #tpu.pipeline_mode<synchronous>, transform_indices = @transform_4, window_bounds = array<i64: 1, 64>}, {pipeline_mode = #tpu.pipeline_mode<synchronous>, transform_indices = @transform_5, window_bounds = array<i64: 1, 64>}, {pipeline_mode = #tpu.pipeline_mode<synchronous>, transform_indices = @transform_6, window_bounds = array<i64: 1, 1>}, {transform_indices = @transform_7, window_bounds = array<i64: 1, 384>}]} {
    %c0 = arith.constant 0 : index
    %c0_0 = arith.constant 0 : index
    %0 = vector.load %arg1[%c0, %c0_0] : memref<384x32xf32, #tpu.memory_space<vmem>>, vector<384x32xf32>
    %1 = arith.truncf %0 : vector<384x32xf32> to vector<384x32xbf16>
    %c0_1 = arith.constant 0 : index
    %c0_2 = arith.constant 0 : index
    %2 = vector.load %arg2[%c0_1, %c0_2] : memref<32x64xbf16, #tpu.memory_space<vmem>>, vector<32x64xbf16>
    %cst = arith.constant dense<0.000000e+00> : vector<384x64xf32>
    %3 = tpu.matmul %1, %2, %cst {dimension_numbers = #tpu.dot_dimension_numbers<[1], [0], [0], [1], [0, 0, 1, 1], [], []>} : vector<384x32xbf16>, vector<32x64xbf16>, vector<384x64xf32> -> vector<384x64xf32>
    %c0_3 = arith.constant 0 : index
    %c0_4 = arith.constant 0 : index
    %4 = vector.load %arg3[%c0_3, %c0_4] : memref<1x64xf32, #tpu.memory_space<vmem>>, vector<1x64xf32>
    %5 = vector.broadcast %4 : vector<1x64xf32> to vector<384x64xf32>
    %6 = arith.addf %3, %5 : vector<384x64xf32>
    %cst_5 = arith.constant 0.000000e+00 : f32
    %7 = vector.broadcast %cst_5 : f32 to vector<384x64xf32>
    %8 = arith.maximumf %6, %7 : vector<384x64xf32>
    %9 = arith.truncf %8 : vector<384x64xf32> to vector<384x64xbf16>
    %c0_6 = arith.constant 0 : index
    %c0_7 = arith.constant 0 : index
    %10 = vector.load %arg4[%c0_6, %c0_7] : memref<64x64xbf16, #tpu.memory_space<vmem>>, vector<64x64xbf16>
    %cst_8 = arith.constant dense<0.000000e+00> : vector<384x64xf32>
    %11 = tpu.matmul %9, %10, %cst_8 {dimension_numbers = #tpu.dot_dimension_numbers<[1], [0], [0], [1], [0, 0, 1, 1], [], []>} : vector<384x64xbf16>, vector<64x64xbf16>, vector<384x64xf32> -> vector<384x64xf32>
    %c0_9 = arith.constant 0 : index
    %c0_10 = arith.constant 0 : index
    %12 = vector.load %arg5[%c0_9, %c0_10] : memref<1x64xf32, #tpu.memory_space<vmem>>, vector<1x64xf32>
    %13 = vector.broadcast %12 : vector<1x64xf32> to vector<384x64xf32>
    %14 = arith.addf %11, %13 : vector<384x64xf32>
    %cst_11 = arith.constant 0.000000e+00 : f32
    %15 = vector.broadcast %cst_11 : f32 to vector<384x64xf32>
    %16 = arith.maximumf %14, %15 : vector<384x64xf32>
    %c0_12 = arith.constant 0 : index
    %c0_13 = arith.constant 0 : index
    %17 = vector.load %arg6[%c0_12, %c0_13] : memref<1x64xbf16, #tpu.memory_space<vmem>>, vector<1x64xbf16>
    %18 = arith.truncf %16 : vector<384x64xf32> to vector<384x64xbf16>
    %cst_14 = arith.constant dense<0.000000e+00> : vector<1x384xf32>
    %19 = tpu.matmul %17, %18, %cst_14 {dimension_numbers = #tpu.dot_dimension_numbers<[1], [1], [0], [0], [0, 0, 1, 0], [], []>} : vector<1x64xbf16>, vector<384x64xbf16>, vector<1x384xf32> -> vector<1x384xf32>
    %c0_15 = arith.constant 0 : index
    %c0_16 = arith.constant 0 : index
    %20 = vector.load %arg7[%c0_15, %c0_16] : memref<1x1xf32, #tpu.memory_space<vmem>>, vector<1x1xf32>
    %21 = vector.extract %20[0, 0] : f32 from vector<1x1xf32>
    %22 = vector.broadcast %21 : f32 to vector<1x384xf32>
    %23 = arith.addf %19, %22 : vector<1x384xf32>
    %c0_17 = arith.constant 0 : index
    %c0_18 = arith.constant 0 : index
    %24 = vector.load %arg8[%c0_17, %c0_18] : memref<1x384xf32, #tpu.memory_space<vmem>>, vector<1x384xf32>
    tpu.vector_store %arg8[%c0_17, %c0_18], %23 {strides = array<i32>} : memref<1x384xf32, #tpu.memory_space<vmem>>, vector<1x384xf32>,
    return
  }
  func.func @transform_0(%arg0: i32) -> (i32, i32) {
    %c0_i32 = arith.constant 0 : i32
    %c0_i32_0 = arith.constant 0 : i32
    return %arg0, %c0_i32 : i32, i32
  }
  func.func @transform_1(%arg0: i32) -> (i32, i32) {
    %c0_i32 = arith.constant 0 : i32
    %c0_i32_0 = arith.constant 0 : i32
    %c0_i32_1 = arith.constant 0 : i32
    return %c0_i32, %c0_i32_0 : i32, i32
  }
  func.func @transform_2(%arg0: i32) -> (i32, i32) {
    %c0_i32 = arith.constant 0 : i32
    %c0_i32_0 = arith.constant 0 : i32
    %c0_i32_1 = arith.constant 0 : i32
    return %c0_i32, %c0_i32_0 : i32, i32
  }
  func.func @transform_3(%arg0: i32) -> (i32, i32) {
    %c0_i32 = arith.constant 0 : i32
    %c0_i32_0 = arith.constant 0 : i32
    %c0_i32_1 = arith.constant 0 : i32
    return %c0_i32, %c0_i32_0 : i32, i32
  }
  func.func @transform_4(%arg0: i32) -> (i32, i32) {
    %c0_i32 = arith.constant 0 : i32
    %c0_i32_0 = arith.constant 0 : i32
    %c0_i32_1 = arith.constant 0 : i32
    return %c0_i32, %c0_i32_0 : i32, i32
  }
  func.func @transform_5(%arg0: i32) -> (i32, i32) {
    %c0_i32 = arith.constant 0 : i32
    %c0_i32_0 = arith.constant 0 : i32
    %c0_i32_1 = arith.constant 0 : i32
    return %c0_i32, %c0_i32_0 : i32, i32
  }
  func.func @transform_6(%arg0: i32) -> (i32, i32) {
    %c0_i32 = arith.constant 0 : i32
    %c0_i32_0 = arith.constant 0 : i32
    %c0_i32_1 = arith.constant 0 : i32
    return %c0_i32, %c0_i32_0 : i32, i32
  }
  func.func @transform_7(%arg0: i32) -> (i32, i32) {
    %c0_i32 = arith.constant 0 : i32
    %c0_i32_0 = arith.constant 0 : i32
    return %c0_i32, %arg0 : i32, i32
  }
}

</mosaic_0001>

<bundles_post_ra>
// kernel: global_workspace_forward.1
= control target key start
LH: loop header
LB: loop body
LE: loop exit
PB: predicated region body
PF: predicated region fallthrough
CT: control target
= control target key end

     0   :  { %vm121_vm0 = vcmask 261120   ;;  %vm431_vm1 = vcmask 523264   ;;  %vm828_vm2 = vcmask 1040384   ;;  %vm830_vm3 = vcmask 1041408   ;;  %s1370_s1 = inlined_call_operand.vmem [shape: bf16[32,64], index: 1, kind: input, shape index: {}]   ;;  %s1371_s0 = inlined_call_operand.vmem [shape: f32[384,32], index: 0, kind: input, shape index: {}]   ;;  %s1372_s2 = inlined_call_operand.vmem [shape: f32[1,64], index: 2, kind: input, shape index: {}]   ;;  %s1373_s3 = inlined_call_operand.vmem [shape: bf16[64,64], index: 3, kind: input, shape index: {}]   ;;  %s1374_s4 = inlined_call_operand.vmem [shape: f32[1,64], index: 4, kind: input, shape index: {}]   ;;  %s1375_s5 = inlined_call_operand.vmem [shape: bf16[1,64], index: 5, kind: input, shape index: {}]   ;;  %s1376_s6 = inlined_call_operand.<no memory space> [shape: f32[1,1], index: 6, kind: input, shape index: {}]   ;;  %s1377_s7 = inlined_call_operand.vmem [shape: f32[1,384], index: 7, kind: output, shape index: {}]  }
   0x1   :  { %v918_v0 = vld [vmem:[%s1370_s1 + $0x8] sm:$0xff]  ;;  %v917_v1 = vld [vmem:[%s1370_s1] sm:$0xff]  ;;  %v31_v8 = vld [vmem:[%s1371_s0 + $0x10] sm:$0xff] }
   0x2   :  { %v29_v2 = vld [vmem:[%s1371_s0] sm:$0xff]  ;;  %200 = vmatpush.bf16.msra.mxu0 %v918_v0  ;;  %v30_v3 = vld [vmem:[%s1371_s0 + $0x8] sm:$0xff]  ;;  %923 = vmatpush.bf16.msra.mxu2 %v918_v0  ;;  %v32_v9 = vld [vmem:[%s1371_s0 + $0x18] sm:$0xff] }
   0x3   :  { %v57_v4 = vld [vmem:[%s1371_s0 + $0xe0] sm:$0xff]  ;;  %v58_v5 = vld [vmem:[%s1371_s0 + $0xe8] sm:$0xff]  ;;  %v77_v6 = vpack.c.bf16 %v30_v3, %v29_v2  ;;  %v59_v10 = vld [vmem:[%s1371_s0 + $0xf0] sm:$0xff]  ;;  %v78_v12 = vpack.c.bf16 %v32_v9, %v31_v8 }
   0x4   :  { %v91_v7 = vpack.c.bf16 %v58_v5, %v57_v4  ;;  %v60_v11 = vld [vmem:[%s1371_s0 + $0xf8] sm:$0xff]  ;;  %v33_v14 = vld [vmem:[%s1371_s0 + $0x20] sm:$0xff]  ;;  %v34_v15 = vld [vmem:[%s1371_s0 + $0x28] sm:$0xff] }
   0x5   :  { %v92_v13 = vpack.c.bf16 %v60_v11, %v59_v10  ;;  %v61_v16 = vld [vmem:[%s1371_s0 + $0x100] sm:$0xff]  ;;  %v62_v17 = vld [vmem:[%s1371_s0 + $0x108] sm:$0xff]  ;;  %v79_v18 = vpack.c.bf16 %v34_v15, %v33_v14  ;;  %v35_v20 = vld [vmem:[%s1371_s0 + $0x30] sm:$0xff] }
   0x6   :  { %201 = vmatpush.bf16.msra.mxu0 %v917_v1  ;;  %924 = vmatpush.bf16.msra.mxu2 %v917_v1  ;;  %v93_v19 = vpack.c.bf16 %v62_v17, %v61_v16  ;;  %v36_v21 = vld [vmem:[%s1371_s0 + $0x38] sm:$0xff]  ;;  %v63_v22 = vld [vmem:[%s1371_s0 + $0x110] sm:$0xff]  ;;  %v37_v26 = vld [vmem:[%s1371_s0 + $0x40] sm:$0xff] }
   0x7   :  { %v64_v23 = vld [vmem:[%s1371_s0 + $0x118] sm:$0xff]  ;;  %v80_v24 = vpack.c.bf16 %v36_v21, %v35_v20  ;;  %v38_v27 = vld [vmem:[%s1371_s0 + $0x48] sm:$0xff]  ;;  %v65_v28 = vld [vmem:[%s1371_s0 + $0x120] sm:$0xff] }
   0x8   :  { %v94_v25 = vpack.c.bf16 %v64_v23, %v63_v22  ;;  %v66_v29 = vld [vmem:[%s1371_s0 + $0x128] sm:$0xff]  ;;  %v81_v30 = vpack.c.bf16 %v38_v27, %v37_v26  ;;  %v39_v32 = vld [vmem:[%s1371_s0 + $0x50] sm:$0xff]  ;;  %v40_v33 = vld [vmem:[%s1371_s0 + $0x58] sm:$0xff] }
   0x9   :  { %850 = vmatmul.msk.bf16.vlgmr.msra.gmra.mxu0 %vm121_vm0, %v77_v6  ;;  %864 = vmatmul.msk.bf16.vlgmr.msra.gmra.mxu2 %vm121_vm0, %v91_v7  ;;  %v95_v31 = vpack.c.bf16 %v66_v29, %v65_v28  ;;  %v67_v34 = vld [vmem:[%s1371_s0 + $0x130] sm:$0xff]  ;;  %v68_v35 = vld [vmem:[%s1371_s0 + $0x138] sm:$0xff]  ;;  %v82_v36 = vpack.c.bf16 %v40_v33, %v39_v32  ;;  %v41_v38 = vld [vmem:[%s1371_s0 + $0x60] sm:$0xff] }
   0xa   :  { %v96_v37 = vpack.c.bf16 %v68_v35, %v67_v34  ;;  %v42_v39 = vld [vmem:[%s1371_s0 + $0x68] sm:$0xff]  ;;  %v69_v40 = vld [vmem:[%s1371_s0 + $0x140] sm:$0xff]  ;;  %v922_v42 = vld [vmem:[%s1373_s3 + $0x18] sm:$0xff] }
   0xb   :  { %v70_v41 = vld [vmem:[%s1371_s0 + $0x148] sm:$0xff]  ;;  %v83_v43 = vpack.c.bf16 %v42_v39, %v41_v38  ;;  %508 = vmatpush.bf16.msra.mxu1 %v922_v42  ;;  %925 = vmatpush.bf16.msra.mxu3 %v922_v42  ;;  %v921_v45 = vld [vmem:[%s1373_s3 + $0x10] sm:$0xff]  ;;  %v919_v47 = vld [vmem:[%s1373_s3] sm:$0xff] }
   0xc   :  { %v97_v44 = vpack.c.bf16 %v70_v41, %v69_v40  ;;  %v920_v46 = vld [vmem:[%s1373_s3 + $0x8] sm:$0xff]  ;;  %v43_v48 = vld [vmem:[%s1371_s0 + $0x70] sm:$0xff]  ;;  %v44_v49 = vld [vmem:[%s1371_s0 + $0x78] sm:$0xff] }
   0xd   :  { %v71_v50 = vld [vmem:[%s1371_s0 + $0x150] sm:$0xff]  ;;  %v72_v51 = vld [vmem:[%s1371_s0 + $0x158] sm:$0xff]  ;;  %v84_v52 = vpack.c.bf16 %v44_v49, %v43_v48  ;;  %v45_v54 = vld [vmem:[%s1371_s0 + $0x80] sm:$0xff] }
   0xe   :  { %v98_v53 = vpack.c.bf16 %v72_v51, %v71_v50  ;;  %v46_v55 = vld [vmem:[%s1371_s0 + $0x88] sm:$0xff]  ;;  %v73_v56 = vld [vmem:[%s1371_s0 + $0x160] sm:$0xff]  ;;  %v47_v4 = vld [vmem:[%s1371_s0 + $0x90] sm:$0xff] }
   0xf   :  { %509 = vmatpush.bf16.msra.mxu1 %v921_v45  ;;  %926 = vmatpush.bf16.msra.mxu3 %v921_v45  ;;  %v74_v57 = vld [vmem:[%s1371_s0 + $0x168] sm:$0xff]  ;;  %v85_v58 = vpack.c.bf16 %v46_v55, %v45_v54  ;;  %v1118_v61 = vld [vmem:[%s1372_s2] ss:$0 sm:$0xff]  ;;  %v48_v6 = vld [vmem:[%s1371_s0 + $0x98] sm:$0xff] }
  0x10   :  { %v99_v59 = vpack.c.bf16 %v74_v57, %v73_v56  ;;  %v75_v7 = vld [vmem:[%s1371_s0 + $0x170] sm:$0xff]  ;;  %v76_v8 = vld [vmem:[%s1371_s0 + $0x178] sm:$0xff]  ;;  %v86_v11 = vpack.c.bf16 %v48_v6, %v47_v4  ;;  %v50_v26 = vld [vmem:[%s1371_s0 + $0xa8] sm:$0xff] }
  0x11   :  { %v100_v14 = vpack.c.bf16 %v76_v8, %v75_v7  ;;  %v51_v42 = vld [vmem:[%s1371_s0 + $0xb0] sm:$0xff] }
  0x13   :  { %510 = vmatpush.bf16.msra.mxu1 %v920_v46  ;;  %927 = vmatpush.bf16.msra.mxu3 %v920_v46 }
  0x17   :  { %511 = vmatpush.bf16.msra.mxu1 %v919_v47  ;;  %928 = vmatpush.bf16.msra.mxu3 %v919_v47 }
  0x19   :  { %851 = vmatmul.msk.bf16.gmra.mxu0 %vm121_vm0, %v78_v12  ;;  %865 = vmatmul.msk.bf16.gmra.mxu2 %vm121_vm0, %v92_v13 }
  0x29   :  { %852 = vmatmul.msk.bf16.gmra.mxu0 %vm121_vm0, %v79_v18  ;;  %866 = vmatmul.msk.bf16.gmra.mxu2 %vm121_vm0, %v93_v19 }
  0x39   :  { %853 = vmatmul.msk.bf16.gmra.mxu0 %vm121_vm0, %v80_v24  ;;  %867 = vmatmul.msk.bf16.gmra.mxu2 %vm121_vm0, %v94_v25  ;;  %v49_v25 = vld [vmem:[%s1371_s0 + $0xa0] sm:$0xff] }
  0x3a   :  { %v87_v29 = vpack.c.bf16 %v50_v26, %v49_v25 }
  0x49   :  { %854 = vmatmul.msk.bf16.gmra.mxu0 %vm121_vm0, %v81_v30  ;;  %868 = vmatmul.msk.bf16.gmra.mxu2 %vm121_vm0, %v95_v31 }
  0x59   :  { %855 = vmatmul.msk.bf16.gmra.mxu0 %vm121_vm0, %v82_v36  ;;  %869 = vmatmul.msk.bf16.gmra.mxu2 %vm121_vm0, %v96_v37 }
  0x69   :  { %856 = vmatmul.msk.bf16.gmra.mxu0 %vm121_vm0, %v83_v43  ;;  %870 = vmatmul.msk.bf16.gmra.mxu2 %vm121_vm0, %v97_v44  ;;  %v52_v43 = vld [vmem:[%s1371_s0 + $0xb8] sm:$0xff] }
  0x6a   :  { %v88_v46 = vpack.c.bf16 %v52_v43, %v51_v42 }
  0x79   :  { %857 = vmatmul.msk.bf16.gmra.mxu0 %vm121_vm0, %v84_v52  ;;  %871 = vmatmul.msk.bf16.gmra.mxu2 %vm121_vm0, %v98_v53 }
  0x86   :  { %v203_v60 = vpop.f32.mrf.mxu0 }
  0x87   :  { %v204_v63 = vadd.f32 %v1118_v61, %v203_v60  ;;  %v54_v60 = vld [vmem:[%s1371_s0 + $0xc8] sm:$0xff] }
  0x89   :  { %858 = vmatmul.msk.bf16.gmra.mxu0 %vm121_vm0, %v85_v58  ;;  %872 = vmatmul.msk.bf16.gmra.mxu2 %vm121_vm0, %v99_v59  ;;  %v323_v2 = vmax.f32 %v204_v63, 0.0  ;;  %v53_v59 = vld [vmem:[%s1371_s0 + $0xc0] sm:$0xff] }
  0x8c   :  { %v273_v62 = vpop.f32.mrf.mxu2 }
  0x8d   :  { %v274_v5 = vadd.f32 %v1118_v61, %v273_v62 }
  0x8e   :  { %v205_v0 = vpop.f32.mrf.mxu0 }
  0x8f   :  { %v206_v1 = vadd.f32 %v1118_v61, %v205_v0  ;;  %v351_v12 = vmax.f32 %v274_v5, 0.0  ;;  %v89_v0 = vpack.c.bf16 %v54_v60, %v53_v59 }
  0x91   :  { %v324_v3 = vmax.f32 %v206_v1, 0.0 }
  0x93   :  { %v371_v9 = vpack.c.bf16 %v324_v3, %v323_v2 }
  0x94   :  { %v275_v10 = vpop.f32.mrf.mxu2 }
  0x95   :  { %890 = vmatmul.msk.bf16.vlgmr.msra.gmra.mxu1 %vm431_vm1, %v371_v9  ;;  %v276_v13 = vadd.f32 %v1118_v61, %v275_v10 }
  0x96   :  { %v208_v15 = vpop.f32.mrf.mxu0 }
  0x97   :  { %v352_v16 = vmax.f32 %v276_v13, 0.0  ;;  %v209_v19 = vadd.f32 %v1118_v61, %v208_v15  ;;  %v55_v13 = vld [vmem:[%s1371_s0 + $0xd0] sm:$0xff] }
  0x99   :  { %859 = vmatmul.msk.bf16.gmra.mxu0 %vm121_vm0, %v86_v11  ;;  %v1140_v17 = vpack.c.bf16 %v352_v16, %v351_v12  ;;  %873 = vmatmul.msk.bf16.gmra.mxu2 %vm121_vm0, %v100_v14  ;;  %v325_v22 = vmax.f32 %v209_v19, 0.0  ;;  %v56_v14 = vld [vmem:[%s1371_s0 + $0xd8] sm:$0xff] }
  0x9c   :  { %v278_v18 = vpop.f32.mrf.mxu2 }
  0x9d   :  { %v279_v24 = vadd.f32 %v1118_v61, %v278_v18  ;;  %v90_v18 = vpack.c.bf16 %v56_v14, %v55_v13  ;;  %v1219_v13 = vld [vmem:[%s1374_s4] ss:$0 sm:$0xff] }
  0x9e   :  { %v210_v20 = vpop.f32.mrf.mxu0 }
  0x9f   :  { %v211_v21 = vadd.f32 %v1118_v61, %v210_v20  ;;  %v353_v30 = vmax.f32 %v279_v24, 0.0 }
  0xa1   :  { %v326_v23 = vmax.f32 %v211_v21, 0.0 }
  0xa3   :  { %v372_v27 = vpack.c.bf16 %v326_v23, %v325_v22 }
  0xa4   :  { %v280_v28 = vpop.f32.mrf.mxu2 }
  0xa5   :  { %891 = vmatmul.msk.bf16.gmra.mxu1 %vm431_vm1, %v372_v27  ;;  %v281_v31 = vadd.f32 %v1118_v61, %v280_v28 }
  0xa6   :  { %v213_v32 = vpop.f32.mrf.mxu0 }
  0xa7   :  { %v354_v33 = vmax.f32 %v281_v31, 0.0  ;;  %v214_v36 = vadd.f32 %v1118_v61, %v213_v32 }
  0xa9   :  { %860 = vmatmul.msk.bf16.gmra.mxu0 %vm121_vm0, %v87_v29  ;;  %v386_v34 = vpack.c.bf16 %v354_v33, %v353_v30  ;;  %v327_v39 = vmax.f32 %v214_v36, 0.0 }
  0xab   :  { %905 = vmatmul.msk.bf16.vlgmr.msra.gmra.mxu3 %vm431_vm1, %v386_v34 }
  0xac   :  { %v283_v35 = vpop.f32.mrf.mxu2 }
  0xad   :  { %v284_v41 = vadd.f32 %v1118_v61, %v283_v35 }
  0xae   :  { %v215_v37 = vpop.f32.mrf.mxu0 }
  0xaf   :  { %v216_v38 = vadd.f32 %v1118_v61, %v215_v37  ;;  %v355_v47 = vmax.f32 %v284_v41, 0.0 }
  0xb1   :  { %v328_v40 = vmax.f32 %v216_v38, 0.0 }
  0xb3   :  { %v373_v44 = vpack.c.bf16 %v328_v40, %v327_v39 }
  0xb4   :  { %v285_v45 = vpop.f32.mrf.mxu2 }
  0xb5   :  { %892 = vmatmul.msk.bf16.gmra.mxu1 %vm431_vm1, %v373_v44  ;;  %v286_v48 = vadd.f32 %v1118_v61, %v285_v45 }
  0xb6   :  { %v218_v49 = vpop.f32.mrf.mxu0 }
  0xb7   :  { %v356_v50 = vmax.f32 %v286_v48, 0.0  ;;  %v219_v53 = vadd.f32 %v1118_v61, %v218_v49 }
  0xb9   :  { %861 = vmatmul.msk.bf16.gmra.mxu0 %vm121_vm0, %v88_v46  ;;  %v387_v51 = vpack.c.bf16 %v356_v50, %v355_v47  ;;  %v329_v56 = vmax.f32 %v219_v53, 0.0 }
  0xbb   :  { %906 = vmatmul.msk.bf16.gmra.mxu3 %vm431_vm1, %v387_v51 }
  0xbc   :  { %v288_v52 = vpop.f32.mrf.mxu2 }
  0xbd   :  { %v289_v58 = vadd.f32 %v1118_v61, %v288_v52 }
  0xbe   :  { %v220_v54 = vpop.f32.mrf.mxu0 }
  0xbf   :  { %v221_v55 = vadd.f32 %v1118_v61, %v220_v54  ;;  %v357_v1 = vmax.f32 %v289_v58, 0.0 }
  0xc1   :  { %v330_v57 = vmax.f32 %v221_v55, 0.0 }
  0xc3   :  { %v374_v62 = vpack.c.bf16 %v330_v57, %v329_v56 }
  0xc4   :  { %v290_v63 = vpop.f32.mrf.mxu2 }
  0xc5   :  { %893 = vmatmul.msk.bf16.gmra.mxu1 %vm431_vm1, %v374_v62  ;;  %v291_v2 = vadd.f32 %v1118_v61, %v290_v63 }
  0xc6   :  { %v223_v3 = vpop.f32.mrf.mxu0 }
  0xc7   :  { %v358_v4 = vmax.f32 %v291_v2, 0.0  ;;  %v224_v7 = vadd.f32 %v1118_v61, %v223_v3 }
  0xc9   :  { %862 = vmatmul.msk.bf16.gmra.mxu0 %vm121_vm0, %v89_v0  ;;  %v388_v5 = vpack.c.bf16 %v358_v4, %v357_v1  ;;  %v331_v10 = vmax.f32 %v224_v7, 0.0 }
  0xcb   :  { %907 = vmatmul.msk.bf16.gmra.mxu3 %vm431_vm1, %v388_v5 }
  0xcc   :  { %v293_v6 = vpop.f32.mrf.mxu2 }
  0xcd   :  { %v294_v12 = vadd.f32 %v1118_v61, %v293_v6 }
  0xce   :  { %v225_v8 = vpop.f32.mrf.mxu0 }
  0xcf   :  { %v226_v9 = vadd.f32 %v1118_v61, %v225_v8  ;;  %v359_v19 = vmax.f32 %v294_v12, 0.0 }
  0xd1   :  { %v332_v11 = vmax.f32 %v226_v9, 0.0 }
  0xd3   :  { %v375_v15 = vpack.c.bf16 %v332_v11, %v331_v10 }
  0xd4   :  { %v295_v16 = vpop.f32.mrf.mxu2 }
  0xd5   :  { %894 = vmatmul.msk.bf16.gmra.mxu1 %vm431_vm1, %v375_v15  ;;  %v296_v20 = vadd.f32 %v1118_v61, %v295_v16 }
  0xd6   :  { %v228_v21 = vpop.f32.mrf.mxu0 }
  0xd7   :  { %v360_v22 = vmax.f32 %v296_v20, 0.0  ;;  %v229_v25 = vadd.f32 %v1118_v61, %v228_v21 }
  0xd9   :  { %863 = vmatmul.msk.bf16.gmra.mxu0 %vm121_vm0, %v90_v18  ;;  %v389_v23 = vpack.c.bf16 %v360_v22, %v359_v19  ;;  %v333_v28 = vmax.f32 %v229_v25, 0.0 }
  0xdb   :  { %908 = vmatmul.msk.bf16.gmra.mxu3 %vm431_vm1, %v389_v23 }
  0xdc   :  { %v298_v24 = vpop.f32.mrf.mxu2 }
  0xdd   :  { %v299_v30 = vadd.f32 %v1118_v61, %v298_v24 }
  0xde   :  { %v230_v26 = vpop.f32.mrf.mxu0 }
  0xdf   :  { %v231_v27 = vadd.f32 %v1118_v61, %v230_v26  ;;  %v361_v33 = vmax.f32 %v299_v30, 0.0 }
  0xe1   :  { %v334_v29 = vmax.f32 %v231_v27, 0.0 }
  0xe3   :  { %v376_v31 = vpack.c.bf16 %v334_v29, %v333_v28 }
  0xe4   :  { %v300_v32 = vpop.f32.mrf.mxu2 }
  0xe5   :  { %895 = vmatmul.msk.bf16.gmra.mxu1 %vm431_vm1, %v376_v31  ;;  %v301_v34 = vadd.f32 %v1118_v61, %v300_v32 }
  0xe6   :  { %v233_v35 = vpop.f32.mrf.mxu0 }
  0xe7   :  { %v362_v36 = vmax.f32 %v301_v34, 0.0  ;;  %v234_v39 = vadd.f32 %v1118_v61, %v233_v35 }
  0xe9   :  { %v390_v37 = vpack.c.bf16 %v362_v36, %v361_v33  ;;  %v335_v42 = vmax.f32 %v234_v39, 0.0 }
  0xeb   :  { %909 = vmatmul.msk.bf16.gmra.mxu3 %vm431_vm1, %v390_v37 }
  0xec   :  { %v303_v38 = vpop.f32.mrf.mxu2 }
  0xed   :  { %v304_v44 = vadd.f32 %v1118_v61, %v303_v38 }
  0xee   :  { %v235_v40 = vpop.f32.mrf.mxu0 }
  0xef   :  { %v236_v41 = vadd.f32 %v1118_v61, %v235_v40  ;;  %v363_v47 = vmax.f32 %v304_v44, 0.0 }
  0xf1   :  { %v336_v43 = vmax.f32 %v236_v41, 0.0 }
  0xf3   :  { %v377_v45 = vpack.c.bf16 %v336_v43, %v335_v42 }
  0xf4   :  { %v305_v46 = vpop.f32.mrf.mxu2 }
  0xf5   :  { %896 = vmatmul.msk.bf16.gmra.mxu1 %vm431_vm1, %v377_v45  ;;  %v306_v48 = vadd.f32 %v1118_v61, %v305_v46 }
  0xf6   :  { %v238_v49 = vpop.f32.mrf.mxu0 }
  0xf7   :  { %v364_v50 = vmax.f32 %v306_v48, 0.0  ;;  %v239_v53 = vadd.f32 %v1118_v61, %v238_v49 }
  0xf9   :  { %v391_v51 = vpack.c.bf16 %v364_v50, %v363_v47  ;;  %v337_v56 = vmax.f32 %v239_v53, 0.0 }
  0xfb   :  { %910 = vmatmul.msk.bf16.gmra.mxu3 %vm431_vm1, %v391_v51 }
  0xfc   :  { %v308_v52 = vpop.f32.mrf.mxu2 }
  0xfd   :  { %v309_v58 = vadd.f32 %v1118_v61, %v308_v52 }
  0xfe   :  { %v240_v54 = vpop.f32.mrf.mxu0 }
  0xff   :  { %v241_v55 = vadd.f32 %v1118_v61, %v240_v54  ;;  %v365_v62 = vmax.f32 %v309_v58, 0.0 }
 0x101   :  { %v338_v57 = vmax.f32 %v241_v55, 0.0 }
 0x103   :  { %v378_v59 = vpack.c.bf16 %v338_v57, %v337_v56 }
 0x104   :  { %v310_v60 = vpop.f32.mrf.mxu2 }
 0x105   :  { %897 = vmatmul.msk.bf16.gmra.mxu1 %vm431_vm1, %v378_v59  ;;  %v311_v63 = vadd.f32 %v1118_v61, %v310_v60 }
 0x106   :  { %v243_v0 = vpop.f32.mrf.mxu0 }
 0x107   :  { %v366_v1 = vmax.f32 %v311_v63, 0.0  ;;  %v244_v4 = vadd.f32 %v1118_v61, %v243_v0 }
 0x109   :  { %v392_v2 = vpack.c.bf16 %v366_v1, %v365_v62  ;;  %v339_v7 = vmax.f32 %v244_v4, 0.0 }
 0x10b   :  { %911 = vmatmul.msk.bf16.gmra.mxu3 %vm431_vm1, %v392_v2 }
 0x10c   :  { %v313_v3 = vpop.f32.mrf.mxu2 }
 0x10d   :  { %v314_v9 = vadd.f32 %v1118_v61, %v313_v3 }
 0x10e   :  { %v245_v5 = vpop.f32.mrf.mxu0 }
 0x10f   :  { %v246_v6 = vadd.f32 %v1118_v61, %v245_v5  ;;  %v367_v14 = vmax.f32 %v314_v9, 0.0 }
 0x111   :  { %v340_v8 = vmax.f32 %v246_v6, 0.0 }
 0x112   :  { %v513_v10 = vpop.f32.mrf.mxu1 }
 0x113   :  { %v379_v11 = vpack.c.bf16 %v340_v8, %v339_v7  ;;  %v514_v19 = vadd.f32 %v1219_v13, %v513_v10 }
 0x114   :  { %v315_v12 = vpop.f32.mrf.mxu2 }
 0x115   :  { %898 = vmatmul.msk.bf16.gmra.mxu1 %vm431_vm1, %v379_v11  ;;  %v316_v15 = vadd.f32 %v1118_v61, %v315_v12  ;;  %v633_v24 = vmax.f32 %v514_v19, 0.0 }
 0x116   :  { %v248_v16 = vpop.f32.mrf.mxu0 }
 0x117   :  { %v368_v18 = vmax.f32 %v316_v15, 0.0  ;;  %v249_v25 = vadd.f32 %v1118_v61, %v248_v16 }
 0x119   :  { %v393_v20 = vpack.c.bf16 %v368_v18, %v367_v14  ;;  %v341_v30 = vmax.f32 %v249_v25, 0.0 }
 0x11a   :  { %v515_v21 = vpop.f32.mrf.mxu1 }
 0x11b   :  { %v516_v22 = vadd.f32 %v1219_v13, %v515_v21  ;;  %912 = vmatmul.msk.bf16.gmra.mxu3 %vm431_vm1, %v393_v20 }
 0x11c   :  { %v318_v23 = vpop.f32.mrf.mxu2 }
 0x11d   :  { %v634_v26 = vmax.f32 %v516_v22, 0.0  ;;  %v319_v32 = vadd.f32 %v1118_v61, %v318_v23 }
 0x11e   :  { %v250_v27 = vpop.f32.mrf.mxu0 }
 0x11f   :  { %v251_v28 = vadd.f32 %v1118_v61, %v250_v27  ;;  %v1228_v29 = vpack.c.bf16 %v634_v26, %v633_v24  ;;  %v369_v36 = vmax.f32 %v319_v32, 0.0 }
 0x121   :  { %v342_v31 = vmax.f32 %v251_v28, 0.0 }
 0x122   :  { %v518_v33 = vpop.f32.mrf.mxu1 }
 0x123   :  { %v380_v34 = vpack.c.bf16 %v342_v31, %v341_v30  ;;  %v519_v40 = vadd.f32 %v1219_v13, %v518_v33 }
 0x124   :  { %v320_v35 = vpop.f32.mrf.mxu2 }
 0x125   :  { %899 = vmatmul.msk.bf16.gmra.mxu1 %vm431_vm1, %v380_v34  ;;  %v321_v37 = vadd.f32 %v1118_v61, %v320_v35  ;;  %v635_v44 = vmax.f32 %v519_v40, 0.0 }
 0x126   :  { %v253_v38 = vpop.f32.mrf.mxu0 }
 0x127   :  { %v370_v39 = vmax.f32 %v321_v37, 0.0  ;;  %v254_v45 = vadd.f32 %v1118_v61, %v253_v38 }
 0x129   :  { %v394_v41 = vpack.c.bf16 %v370_v39, %v369_v36  ;;  %v343_v51 = vmax.f32 %v254_v45, 0.0 }
 0x12a   :  { %v520_v42 = vpop.f32.mrf.mxu1 }
 0x12b   :  { %v521_v43 = vadd.f32 %v1219_v13, %v520_v42  ;;  %913 = vmatmul.msk.bf16.gmra.mxu3 %vm431_vm1, %v394_v41 }
 0x12d   :  { %v636_v46 = vmax.f32 %v521_v43, 0.0 }
 0x12e   :  { %v255_v47 = vpop.f32.mrf.mxu0  ;;  %v588_v48 = vpop.f32.mrf.mxu3 }
 0x12f   :  { %v256_v49 = vadd.f32 %v1118_v61, %v255_v47  ;;  %v1238_v50 = vpack.c.bf16 %v636_v46, %v635_v44  ;;  %v589_v2 = vadd.f32 %v1219_v13, %v588_v48 }
 0x131   :  { %v344_v52 = vmax.f32 %v256_v49, 0.0  ;;  %v663_v9 = vmax.f32 %v589_v2, 0.0 }
 0x132   :  { %v523_v53 = vpop.f32.mrf.mxu1 }
 0x133   :  { %v381_v54 = vpack.c.bf16 %v344_v52, %v343_v51  ;;  %v524_v57 = vadd.f32 %v1219_v13, %v523_v53 }
 0x135   :  { %900 = vmatmul.msk.bf16.gmra.mxu1 %vm431_vm1, %v381_v54  ;;  %v637_v60 = vmax.f32 %v524_v57, 0.0 }
 0x136   :  { %v258_v55 = vpop.f32.mrf.mxu0  ;;  %v590_v56 = vpop.f32.mrf.mxu3 }
 0x137   :  { %v259_v62 = vadd.f32 %v1118_v61, %v258_v55  ;;  %v591_v4 = vadd.f32 %v1219_v13, %v590_v56 }
 0x139   :  { %v345_v6 = vmax.f32 %v259_v62, 0.0  ;;  %v664_v11 = vmax.f32 %v591_v4, 0.0 }
 0x13a   :  { %v525_v58 = vpop.f32.mrf.mxu1 }
 0x13b   :  { %v526_v59 = vadd.f32 %v1219_v13, %v525_v58  ;;  %v697_v19 = vpack.c.bf16 %v664_v11, %v663_v9 }
 0x13d   :  { %v638_v63 = vmax.f32 %v526_v59, 0.0  ;;  %v758_v22 = vsel %vm431_vm1, %v697_v19, 0 }
 0x13e   :  { %v260_v0 = vpop.f32.mrf.mxu0  ;;  %v593_v1 = vpop.f32.mrf.mxu3  ;;  %797 = vmatpush.bf16.xpose.msrb.mxu3 %v758_v22 }
 0x13f   :  { %v261_v3 = vadd.f32 %v1118_v61, %v260_v0  ;;  %v1247_v5 = vpack.c.bf16 %v638_v63, %v637_v60  ;;  %v594_v12 = vadd.f32 %v1219_v13, %v593_v1 }
 0x141   :  { %v346_v7 = vmax.f32 %v261_v3, 0.0  ;;  %v665_v16 = vmax.f32 %v594_v12, 0.0 }
 0x142   :  { %v528_v8 = vpop.f32.mrf.mxu1 }
 0x143   :  { %v382_v10 = vpack.c.bf16 %v346_v7, %v345_v6  ;;  %v529_v20 = vadd.f32 %v1219_v13, %v528_v8 }
 0x145   :  { %901 = vmatmul.msk.bf16.gmra.mxu1 %vm431_vm1, %v382_v10  ;;  %v639_v26 = vmax.f32 %v529_v20, 0.0 }
 0x146   :  { %v263_v14 = vpop.f32.mrf.mxu0  ;;  %v595_v15 = vpop.f32.mrf.mxu3 }
 0x147   :  { %v596_v18 = vadd.f32 %v1219_v13, %v595_v15  ;;  %v264_v27 = vadd.f32 %v1118_v61, %v263_v14 }
 0x149   :  { %v666_v21 = vmax.f32 %v596_v18, 0.0  ;;  %v347_v34 = vmax.f32 %v264_v27, 0.0 }
 0x14a   :  { %v530_v23 = vpop.f32.mrf.mxu1 }
 0x14b   :  { %v531_v24 = vadd.f32 %v1219_v13, %v530_v23  ;;  %v1255_v25 = vpack.c.bf16 %v666_v21, %v665_v16 }
 0x14d   :  { %v640_v28 = vmax.f32 %v531_v24, 0.0 }
 0x14e   :  { %v265_v30 = vpop.f32.mrf.mxu0  ;;  %v598_v31 = vpop.f32.mrf.mxu3 }
 0x14f   :  { %v266_v32 = vadd.f32 %v1118_v61, %v265_v30  ;;  %v1259_v33 = vpack.c.bf16 %v640_v28, %v639_v26  ;;  %v599_v38 = vadd.f32 %v1219_v13, %v598_v31 }
 0x151   :  { %v348_v35 = vmax.f32 %v266_v32, 0.0  ;;  %v667_v41 = vmax.f32 %v599_v38, 0.0 }
 0x152   :  { %v533_v36 = vpop.f32.mrf.mxu1 }
 0x153   :  { %v383_v37 = vpack.c.bf16 %v348_v35, %v347_v34  ;;  %v534_v43 = vadd.f32 %v1219_v13, %v533_v36 }
 0x155   :  { %902 = vmatmul.msk.bf16.gmra.mxu1 %vm431_vm1, %v383_v37  ;;  %v641_v48 = vmax.f32 %v534_v43, 0.0 }
 0x156   :  { %v268_v39 = vpop.f32.mrf.mxu0  ;;  %v600_v40 = vpop.f32.mrf.mxu3 }
 0x157   :  { %v601_v42 = vadd.f32 %v1219_v13, %v600_v40  ;;  %v269_v49 = vadd.f32 %v1118_v61, %v268_v39 }
 0x159   :  { %v668_v44 = vmax.f32 %v601_v42, 0.0  ;;  %v349_v56 = vmax.f32 %v269_v49, 0.0 }
 0x15a   :  { %v535_v45 = vpop.f32.mrf.mxu1 }
 0x15b   :  { %v536_v46 = vadd.f32 %v1219_v13, %v535_v45  ;;  %v1266_v47 = vpack.c.bf16 %v668_v44, %v667_v41 }
 0x15d   :  { %v642_v51 = vmax.f32 %v536_v46, 0.0 }
 0x15e   :  { %v270_v52 = vpop.f32.mrf.mxu0  ;;  %v603_v53 = vpop.f32.mrf.mxu3 }
 0x15f   :  { %v271_v54 = vadd.f32 %v1118_v61, %v270_v52  ;;  %v1270_v55 = vpack.c.bf16 %v642_v51, %v641_v48  ;;  %v604_v60 = vadd.f32 %v1219_v13, %v603_v53 }
 0x161   :  { %v350_v57 = vmax.f32 %v271_v54, 0.0  ;;  %v669_v63 = vmax.f32 %v604_v60, 0.0  ;;  %v725_v60 = vsel %vm431_vm1, %v1270_v55, 0 }
 0x162   :  { %v538_v58 = vpop.f32.mrf.mxu1 }
 0x163   :  { %v384_v59 = vpack.c.bf16 %v350_v57, %v349_v56  ;;  %v539_v41 = vadd.f32 %v1219_v13, %v538_v58 }
 0x165   :  { %903 = vmatmul.msk.bf16.gmra.mxu1 %vm431_vm1, %v384_v59  ;;  %v643_v46 = vmax.f32 %v539_v41, 0.0 }
 0x166   :  { %v605_v62 = vpop.f32.mrf.mxu3 }
 0x167   :  { %v606_v0 = vadd.f32 %v1219_v13, %v605_v62 }
 0x169   :  { %v670_v1 = vmax.f32 %v606_v0, 0.0 }
 0x16a   :  { %v540_v2 = vpop.f32.mrf.mxu1 }
 0x16b   :  { %v1275_v3 = vpack.c.bf16 %v670_v1, %v669_v63  ;;  %v541_v38 = vadd.f32 %v1219_v13, %v540_v2 }
 0x16d   :  { %v644_v42 = vmax.f32 %v541_v38, 0.0 }
 0x16e   :  { %v608_v4 = vpop.f32.mrf.mxu3 }
 0x16f   :  { %v609_v6 = vadd.f32 %v1219_v13, %v608_v4  ;;  %v687_v52 = vpack.c.bf16 %v644_v42, %v643_v46 }
 0x171   :  { %v671_v8 = vmax.f32 %v609_v6, 0.0  ;;  %v728_v56 = vsel %vm431_vm1, %v687_v52, 0  ;;  %v767_v52 = vsel %vm431_vm1, %v1275_v3, 0  ;;  %v681_v3 = vld [vmem:[%s1375_s5] sm:$0x1] }
 0x172   :  { %v543_v61 = vpop.f32.mrf.mxu1 }
 0x173   :  { %v544_v31 = vadd.f32 %v1219_v13, %v543_v61  ;;  %v722_v61 = vsel %vm431_vm1, %v1259_v33, 0 }
 0x175   :  { %904 = vmatmul.msk.bf16.gmra.mxu1 %vm431_vm1, %v1140_v17  ;;  %v645_v37 = vmax.f32 %v544_v31, 0.0  ;;  %v713_v31 = vsel %vm431_vm1, %v1228_v29, 0 }
 0x176   :  { %v610_v7 = vpop.f32.mrf.mxu3 }
 0x177   :  { %v611_v9 = vadd.f32 %v1219_v13, %v610_v7 }
 0x179   :  { %v672_v10 = vmax.f32 %v611_v9, 0.0 }
 0x17a   :  { %v545_v11 = vpop.f32.mrf.mxu1 }
 0x17b   :  { %v1281_v12 = vpack.c.bf16 %v672_v10, %v671_v8  ;;  %v546_v26 = vadd.f32 %v1219_v13, %v545_v11  ;;  %v719_v8 = vsel %vm431_vm1, %v1247_v5, 0 }
 0x17d   :  { %v646_v34 = vmax.f32 %v546_v26, 0.0 }
 0x17e   :  { %v613_v14 = vpop.f32.mrf.mxu3 }
 0x17f   :  { %v614_v16 = vadd.f32 %v1219_v13, %v613_v14  ;;  %v688_v39 = vpack.c.bf16 %v646_v34, %v645_v37 }
 0x181   :  { %v673_v19 = vmax.f32 %v614_v16, 0.0  ;;  %v731_v44 = vsel %vm431_vm1, %v688_v39, 0 }
 0x182   :  { %v548_v15 = vpop.f32.mrf.mxu1 }
 0x183   :  { %v549_v21 = vadd.f32 %v1219_v13, %v548_v15 }
 0x185   :  { %v647_v27 = vmax.f32 %v549_v21, 0.0 }
 0x186   :  { %v615_v18 = vpop.f32.mrf.mxu3 }
 0x187   :  { %v616_v20 = vadd.f32 %v1219_v13, %v615_v18 }
 0x189   :  { %v674_v22 = vmax.f32 %v616_v20, 0.0  ;;  %v716_v20 = vsel %vm431_vm1, %v1238_v50, 0 }
 0x18a   :  { %v550_v17 = vpop.f32.mrf.mxu1 }
 0x18b   :  { %v551_v23 = vadd.f32 %v1219_v13, %v550_v17  ;;  %v1287_v24 = vpack.c.bf16 %v674_v22, %v673_v19 }
 0x18d   :  { %v648_v28 = vmax.f32 %v551_v23, 0.0 }
 0x18e   :  { %v1290_v30 = vpop.f32.mrf.mxu3 }
 0x18f   :  { %v689_v32 = vpack.c.bf16 %v648_v28, %v647_v27  ;;  %v619_v37 = vadd.f32 %v1219_v13, %v1290_v30 }
 0x191   :  { %v734_v35 = vsel %vm431_vm1, %v689_v32, 0  ;;  %v675_v42 = vmax.f32 %v619_v37, 0.0 }
 0x192   :  { %v553_v36 = vpop.f32.mrf.mxu1  ;;  %784 = vmatpush.bf16.xpose.msrb.mxu2 %v734_v35 }
 0x193   :  { %v554_v43 = vadd.f32 %v1219_v13, %v553_v36 }
 0x195   :  { %v649_v49 = vmax.f32 %v554_v43, 0.0 }
 0x196   :  { %v620_v40 = vpop.f32.mrf.mxu3 }
 0x197   :  { %v621_v38 = vadd.f32 %v1219_v13, %v620_v40  ;;  %v770_v40 = vsel %vm431_vm1, %v1281_v12, 0 }
 0x199   :  { %v676_v43 = vmax.f32 %v621_v38, 0.0 }
 0x19a   :  { %v555_v45 = vpop.f32.mrf.mxu1  ;;  %785 = vmatpush.bf16.xpose.msrb.mxu2 %v731_v44 }
 0x19b   :  { %v556_v48 = vadd.f32 %v1219_v13, %v555_v45  ;;  %v703_v29 = vpack.c.bf16 %v676_v43, %v675_v42 }
 0x19d   :  { %v650_v51 = vmax.f32 %v556_v48, 0.0  ;;  %v776_v46 = vsel %vm431_vm1, %v703_v29, 0 }
 0x19e   :  { %v623_v53 = vpop.f32.mrf.mxu3 }
 0x19f   :  { %v1299_v54 = vpack.c.bf16 %v650_v51, %v649_v49  ;;  %v624_v5 = vadd.f32 %v1219_v13, %v623_v53  ;;  %v773_v49 = vsel %vm431_vm1, %v1287_v24, 0 }
 0x1a1   :  { %v677_v23 = vmax.f32 %v624_v5, 0.0 }
 0x1a2   :  { %v558_v57 = vpop.f32.mrf.mxu1  ;;  %786 = vmatpush.bf16.xpose.msrb.mxu2 %v728_v56 }
 0x1a3   :  { %v559_v59 = vadd.f32 %v1219_v13, %v558_v57  ;;  %v764_v57 = vsel %vm431_vm1, %v1266_v47, 0  ;;  %v761_v47 = vsel %vm431_vm1, %v1255_v25, 0 }
 0x1a5   :  { %v651_v0 = vmax.f32 %v559_v59, 0.0 }
 0x1a6   :  { %v625_v58 = vpop.f32.mrf.mxu3 }
 0x1a7   :  { %v626_v22 = vadd.f32 %v1219_v13, %v625_v58 }
 0x1a9   :  { %v678_v26 = vmax.f32 %v626_v22, 0.0 }
 0x1aa   :  { %v560_v62 = vpop.f32.mrf.mxu1  ;;  %787 = vmatpush.bf16.xpose.msrb.mxu2 %v725_v60 }
 0x1ab   :  { %v561_v63 = vadd.f32 %v1219_v13, %v560_v62  ;;  %v704_v34 = vpack.c.bf16 %v678_v26, %v677_v23 }
 0x1ad   :  { %v652_v1 = vmax.f32 %v561_v63, 0.0  ;;  %v779_v41 = vsel %vm431_vm1, %v704_v34, 0 }
 0x1ae   :  { %v628_v2 = vpop.f32.mrf.mxu3 }
 0x1af   :  { %v1306_v4 = vpack.c.bf16 %v652_v1, %v651_v0  ;;  %v629_v11 = vadd.f32 %v1219_v13, %v628_v2 }
 0x1b1   :  { %v679_v33 = vmax.f32 %v629_v11, 0.0  ;;  %v12_v11 = vstv %s1376_s6 }
 0x1b2   :  { %v563_v6 = vpop.f32.mrf.mxu1  ;;  %788 = vmatpush.bf16.xpose.msrb.mxu2 %v722_v61  ;;  %13 = vst [vmem:[#allocation2] sm:$0x1] %v12_v11 }
 0x1b3   :  { %v564_v7 = vadd.f32 %v1219_v13, %v563_v6 }
 0x1b5   :  { %v653_v15 = vmax.f32 %v564_v7, 0.0 }
 0x1b6   :  { %v630_v55 = vpop.f32.mrf.mxu3 }
 0x1b7   :  { %v631_v14 = vadd.f32 %v1219_v13, %v630_v55 }
 0x1b9   :  { %v680_v19 = vmax.f32 %v631_v14, 0.0  ;;  %v706_v14 = vld [vmem:[#allocation2] sm:$0x1] }
 0x1ba   :  { %v565_v9 = vpop.f32.mrf.mxu1  ;;  %789 = vmatpush.bf16.xpose.msrb.mxu2 %v719_v8  ;;  %929 = vpush %v706_v14 }
 0x1bb   :  { %v566_v10 = vadd.f32 %v1219_v13, %v565_v9  ;;  %v705_v17 = vpack.c.bf16 %v680_v19, %v679_v33 }
 0x1bd   :  { %v654_v16 = vmax.f32 %v566_v10, 0.0  ;;  %v782_v27 = vsel %vm431_vm1, %v705_v17, 0  ;;  %v833_v17 = vlaneseq }
 0x1bf   :  { %v1316_v18 = vpack.c.bf16 %v654_v16, %v653_v15  ;;  %v740_v15 = vsel %vm431_vm1, %v1306_v4, 0  ;;  %v737_v16 = vsel %vm431_vm1, %v1299_v54, 0  ;;  %vm835_vm4 = vcmp.lt.s32.totalorder %v833_v17, 384 }
 0x1c2   :  { %v568_v21 = vpop.f32.mrf.mxu1  ;;  %790 = vmatpush.bf16.xpose.msrb.mxu2 %v716_v20 }
 0x1c3   :  { %v569_v28 = vadd.f32 %v1219_v13, %v568_v21 }
 0x1c5   :  { %v655_v35 = vmax.f32 %v569_v28, 0.0 }
 0x1ca   :  { %v570_v32 = vpop.f32.mrf.mxu1  ;;  %791 = vmatpush.bf16.xpose.msrb.mxu2 %v713_v31 }
 0x1cb   :  { %v571_v50 = vadd.f32 %v1219_v13, %v570_v32 }
 0x1cd   :  { %v656_v36 = vmax.f32 %v571_v50, 0.0 }
 0x1cf   :  { %v693_v39 = vpack.c.bf16 %v656_v36, %v655_v35 }
 0x1d1   :  { %914 = vmatmul.msk.bf16.vlgmr.msrb.gmra.mxu2 %vm431_vm1, %v681_v3  ;;  %v746_v25 = vsel %vm431_vm1, %v693_v39, 0 }
 0x1d2   :  { %810 = vmatpush.bf16.xpose.msra.mxu2 %v782_v27  ;;  %v573_v44 = vpop.f32.mrf.mxu1 }
 0x1d3   :  { %v574_v6 = vadd.f32 %v1219_v13, %v573_v44 }
 0x1d5   :  { %v657_v55 = vmax.f32 %v574_v6, 0.0 }
 0x1da   :  { %811 = vmatpush.bf16.xpose.msra.mxu2 %v779_v41  ;;  %v575_v45 = vpop.f32.mrf.mxu1 }
 0x1db   :  { %v576_v2 = vadd.f32 %v1219_v13, %v575_v45 }
 0x1dd   :  { %v658_v7 = vmax.f32 %v576_v2, 0.0 }
 0x1df   :  { %v694_v9 = vpack.c.bf16 %v658_v7, %v657_v55 }
 0x1e1   :  { %v749_v10 = vsel %vm431_vm1, %v694_v9, 0 }
 0x1e2   :  { %812 = vmatpush.bf16.xpose.msra.mxu2 %v776_v46  ;;  %v578_v48 = vpop.f32.mrf.mxu1 }
 0x1e3   :  { %v579_v12 = vadd.f32 %v1219_v13, %v578_v48 }
 0x1e5   :  { %v659_v1 = vmax.f32 %v579_v12, 0.0 }
 0x1ea   :  { %813 = vmatpush.bf16.xpose.msra.mxu2 %v773_v49  ;;  %v580_v30 = vpop.f32.mrf.mxu1 }
 0x1eb   :  { %v581_v24 = vadd.f32 %v1219_v13, %v580_v30  ;;  %s930_s6 = spop %929 }
 0x1ec   :  { %v708_v5 = vstv %s930_s6 }
 0x1ed   :  { %v660_v63 = vmax.f32 %v581_v24, 0.0 }
 0x1ef   :  { %v695_v61 = vpack.c.bf16 %v660_v63, %v659_v1 }
 0x1f1   :  { %v752_v8 = vsel %vm431_vm1, %v695_v61, 0 }
 0x1f2   :  { %814 = vmatpush.bf16.xpose.msra.mxu2 %v770_v40  ;;  %v583_v51 = vpop.f32.mrf.mxu1 }
 0x1f3   :  { %v584_v53 = vadd.f32 %v1219_v13, %v583_v51 }
 0x1f5   :  { %v661_v59 = vmax.f32 %v584_v53, 0.0 }
 0x1fa   :  { %815 = vmatpush.bf16.xpose.msra.mxu2 %v767_v52  ;;  %v585_v56 = vpop.f32.mrf.mxu1 }
 0x1fb   :  { %v586_v58 = vadd.f32 %v1219_v13, %v585_v56  ;;  %v743_v13 = vsel %vm431_vm1, %v1316_v18, 0 }
 0x1fd   :  { %v662_v60 = vmax.f32 %v586_v58, 0.0 }
 0x1ff   :  { %v696_v62 = vpack.c.bf16 %v662_v60, %v661_v59 }
 0x201   :  { %v755_v0 = vsel %vm431_vm1, %v696_v62, 0 }
 0x202   :  { %816 = vmatpush.bf16.xpose.msra.mxu2 %v764_v57  ;;  %798 = vmatpush.bf16.xpose.msrb.mxu3 %v755_v0 }
 0x20a   :  { %817 = vmatpush.bf16.xpose.msra.mxu2 %v761_v47  ;;  %799 = vmatpush.bf16.xpose.msrb.mxu3 %v752_v8 }
 0x211   :  { %916 = vmatmul.msk.bf16.vlgmr.msra.gmra.mxu2 %vm431_vm1, %v681_v3 }
 0x212   :  { %800 = vmatpush.bf16.xpose.msrb.mxu3 %v749_v10 }
 0x21a   :  { %801 = vmatpush.bf16.xpose.msrb.mxu3 %v746_v25 }
 0x222   :  { %802 = vmatpush.bf16.xpose.msrb.mxu3 %v743_v13 }
 0x22a   :  { %803 = vmatpush.bf16.xpose.msrb.mxu3 %v740_v15 }
 0x232   :  { %804 = vmatpush.bf16.xpose.msrb.mxu3 %v737_v16 }
 0x239   :  { %915 = vmatmul.msk.bf16.vlgmr.msrb.gmra.mxu3 %vm431_vm1, %v681_v3 }
 0x254   :  { %v793_v33 = vpop.f32.mrf.mxu2 }
 0x255   :  { %v794_v4 = vadd.f32 %v793_v33, %v708_v5 }
 0x25c   :  { %v795_v19 = vpop.f32.mrf.mxu2 }
 0x294   :  { %v819_v20 = vpop.f32.mrf.mxu2 }
 0x295   :  { %v820_v18 = vadd.f32 %v819_v20, %v708_v5 }
 0x297   :  { %v827_v26 = vrot.slane %v820_v18, 6 }
 0x29c   :  { %v821_v21 = vpop.f32.mrf.mxu2 }
 0x2bc   :  { %v806_v22 = vpop.f32.mrf.mxu3 }
 0x2bd   :  { %v807_v23 = vadd.f32 %v806_v22, %v708_v5 }
 0x2bf   :  { %v826_v27 = vrot.slane %v807_v23, 7 }
 0x2c1   :  { %v829_v54 = vsel %vm828_vm2, %v794_v4, %v826_v27 }
 0x2c2   :  { %v831_v28 = vsel %vm830_vm3, %v829_v54, %v827_v26 }
 0x2c3   :  { %837 = vst.msk [vmem:[%s1377_s7] sm:$0x7] %vm835_vm4, %v831_v28 }
 0x2c4   :  { %v808_v31 = vpop.f32.mrf.mxu3 }

</bundles_post_ra>
